<compile_context>
chip_gen: v6e
topology: v6e:2x2x1
jax: 0.10.0
libtpu: 0.0.40
codegen_flags: <defaults>
</compile_context>

<pallas_src>
import functools

import jax
import jax.numpy as jnp
from jax import lax
from jax.experimental import pallas as pl
from jax.experimental.pallas import tpu as pltpu


def _round_up(x, m):
    return ((x + m - 1) // m) * m


# -----------------------------------------------------------------------------
# Pass 1: conv-as-matmul, accumulate per-channel sum / sum-of-squares.
# The (8, N_pad) stats output block is revisited every grid step (accumulator);
# the conv tile itself never leaves VMEM.
# -----------------------------------------------------------------------------
def _conv_stats_kernel(patches_ref, w_ref, stats_ref):
    i = pl.program_id(0)

    conv = jnp.dot(patches_ref[...], w_ref[...],
                   preferred_element_type=jnp.float32)          # (TILE_M, N_pad)

    @pl.when(i == 0)
    def _():
        stats_ref[...] = jnp.zeros_like(stats_ref)

    # Per-channel partial sums (zero-padded M rows contribute 0).
    s = jnp.sum(conv, axis=0, keepdims=True)                    # (1, N_pad)
    sq = jnp.sum(conv * conv, axis=0, keepdims=True)            # (1, N_pad)
    row = lax.broadcasted_iota(jnp.int32, stats_ref.shape, 0)   # (8, N_pad)
    upd = jnp.where(row == 0, s, 0.0) + jnp.where(row == 1, sq, 0.0)
    stats_ref[...] += upd


# -----------------------------------------------------------------------------
# Pass 2: recompute conv tile (MXU), then fused BatchNorm (training-mode batch
# stats) -> gate multiply -> inverted dropout. Grid over M, fully parallel.
# stats / gamma / beta / weight stay resident (constant block index).
# -----------------------------------------------------------------------------
def _bn_gate_dropout_kernel(stats_ref, gamma_ref, beta_ref, patches_ref, w_ref,
                            elu_ref, *rest, m_real, dropout_p, eps):
    if dropout_p > 0.0:
        rand_ref, out_ref = rest
    else:
        (out_ref,) = rest

    conv = jnp.dot(patches_ref[...], w_ref[...],
                   preferred_element_type=jnp.float32)          # (TILE_M, N_pad)

    stats = stats_ref[...]
    inv_m = jnp.float32(1.0 / m_real)
    mean = stats[0:1, :] * inv_m                                # (1, N_pad)
    ex2 = stats[1:2, :] * inv_m
    var = ex2 - mean * mean          # biased variance (PyTorch training-mode BN)
    inv_std = lax.rsqrt(var + jnp.float32(eps))                 # EUP
    scale = gamma_ref[...] * inv_std                            # (1, N_pad)
    shift = beta_ref[...] - mean * scale

    gate = elu_ref[...] * (conv * scale + shift)                # (TILE_M, N_pad)

    if dropout_p > 0.0:
        keep = rand_ref[...] >= jnp.float32(dropout_p)
        gate = jnp.where(keep, gate * jnp.float32(1.0 / (1.0 - dropout_p)),
                         jnp.float32(0.0))

    out_ref[...] = gate.astype(out_ref.dtype)


def _im2col(x, kh, kw):
    """x: (B, C, H, W) -> patches (B*H_out*W_out, C*kh*kw), K ordered (c, i, j)."""
    B, C, H, W = x.shape
    H_out = H - kh + 1
    W_out = W - kw + 1
    cols = []
    for i in range(kh):
        for j in range(kw):
            cols.append(x[:, :, i:i + H_out, j:j + W_out])      # (B, C, Ho, Wo)
    patches = jnp.stack(cols, axis=2)                           # (B, C, kh*kw, Ho, Wo)
    patches = patches.reshape(B, C * kh * kw, H_out, W_out)
    patches = jnp.transpose(patches, (0, 2, 3, 1))              # (B, Ho, Wo, K)
    return patches.reshape(B * H_out * W_out, C * kh * kw), H_out, W_out


def conv_layer_forward(elu_layer, x, weight, gamma, beta, *,
                       dropout_ratio, dropout_uniform=None, eps=1e-5,
                       tile_m=512):
    """ConvLayer.forward (training-mode BN & dropout), NCHW in / NCHW out.

    elu_layer       : (B, C_out, H_out, W_out) f32
    x               : (B, C_in,  H,    W)      f32
    weight          : (C_out, C_in, kh, kw)    f32  (PyTorch Conv2d layout)
    gamma/beta      : (C_out,)                 f32
    dropout_uniform : (B, C_out, H_out, W_out) uniforms in [0,1) for dropout
    """
    B, C_in, H, W = x.shape
    C_out, _, kh, kw = weight.shape
    f32 = jnp.float32
    dropout_p = float(dropout_ratio)

    patches, H_out, W_out = _im2col(x, kh, kw)                  # (M, K)
    M, K = patches.shape

    # MXU / lane-friendly padding: contraction and channel dims to 128.
    K_pad = _round_up(K, 128)
    N_pad = _round_up(C_out, 128)

    # Tile size: big as possible under a conservative VMEM budget
    # (double-buffered: patches + elu + uniforms + out per row).
    budget = 16 * 1024 * 1024
    rows_cap = max(8, (budget // (8 * (K_pad + 3 * N_pad))) // 8 * 8)
    tile_m = max(8, min(_round_up(tile_m, 8), rows_cap, _round_up(M, 8)))
    M_pad = _round_up(M, tile_m)
    grid_m = M_pad // tile_m

    patches_p = jnp.zeros((M_pad, K_pad), f32).at[:M, :K].set(patches.astype(f32))
    w2 = weight.reshape(C_out, K).T.astype(f32)                 # (K, C_out)
    w_p = jnp.zeros((K_pad, N_pad), f32).at[:K, :C_out].set(w2)
    gamma_p = jnp.ones((1, N_pad), f32).at[0, :C_out].set(gamma.astype(f32))
    beta_p = jnp.zeros((1, N_pad), f32).at[0, :C_out].set(beta.astype(f32))

    elu2 = jnp.transpose(elu_layer, (0, 2, 3, 1)).reshape(M, C_out).astype(f32)
    elu_p = jnp.zeros((M_pad, N_pad), f32).at[:M, :C_out].set(elu2)

    vmem_limit = 32 * 1024 * 1024   # explicit budget, safe on v5e/v6e/v7x
    cparams_acc = pltpu.CompilerParams(
        dimension_semantics=("arbitrary",), vmem_limit_bytes=vmem_limit)
    cparams_par = pltpu.CompilerParams(
        dimension_semantics=("parallel",), vmem_limit_bytes=vmem_limit)

    # ---- Pass 1: conv + batch-stat accumulation (stats only leave VMEM) -----
    stats = pl.pallas_call(
        _conv_stats_kernel,
        grid=(grid_m,),
        in_specs=[
            pl.BlockSpec((tile_m, K_pad), lambda i: (i, 0)),    # patches tile
            pl.BlockSpec((K_pad, N_pad), lambda i: (0, 0)),     # weight (resident)
        ],
        out_specs=pl.BlockSpec((8, N_pad), lambda i: (0, 0)),   # stats accumulator
        out_shape=jax.ShapeDtypeStruct((8, N_pad), f32),
        compiler_params=cparams_acc,
    )(patches_p, w_p)

    # ---- Pass 2: recompute conv tile + BN + gate + dropout -------------------
    kernel2 = functools.partial(
        _bn_gate_dropout_kernel,
        m_real=float(M), dropout_p=dropout_p, eps=float(eps))

    in_specs2 = [
        pl.BlockSpec((8, N_pad), lambda i: (0, 0)),             # stats (resident)
        pl.BlockSpec((1, N_pad), lambda i: (0, 0)),             # gamma (resident)
        pl.BlockSpec((1, N_pad), lambda i: (0, 0)),             # beta  (resident)
        pl.BlockSpec((tile_m, K_pad), lambda i: (i, 0)),        # patches tile
        pl.BlockSpec((K_pad, N_pad), lambda i: (0, 0)),         # weight (resident)
        pl.BlockSpec((tile_m, N_pad), lambda i: (i, 0)),        # elu gate tile
    ]
    args2 = [stats, gamma_p, beta_p, patches_p, w_p, elu_p]

    if dropout_p > 0.0:
        if dropout_uniform is None:
            dropout_uniform = jnp.ones((B, C_out, H_out, W_out), f32)  # keep all
        u2 = jnp.transpose(dropout_uniform, (0, 2, 3, 1)).reshape(M, C_out)
        rand_p = jnp.ones((M_pad, N_pad), f32).at[:M, :C_out].set(u2.astype(f32))
        in_specs2.append(pl.BlockSpec((tile_m, N_pad), lambda i: (i, 0)))
        args2.append(rand_p)

    out_p = pl.pallas_call(
        kernel2,
        grid=(grid_m,),
        in_specs=in_specs2,
        out_specs=pl.BlockSpec((tile_m, N_pad), lambda i: (i, 0)),
        out_shape=jax.ShapeDtypeStruct((M_pad, N_pad), f32),
        compiler_params=cparams_par,
    )(*args2)

    out = out_p[:M, :C_out].reshape(B, H_out, W_out, C_out)
    return jnp.transpose(out, (0, 3, 1, 2))                     # back to NCHW


# ---------------------------- pure-JAX reference -----------------------------
def _reference(elu_layer, x, weight, gamma, beta, *, dropout_ratio,
               dropout_uniform, eps=1e-5):
    conv = lax.conv_general_dilated(
        x, weight, window_strides=(1, 1), padding="VALID",
        dimension_numbers=("NCHW", "OIHW", "NCHW"))
    mean = jnp.mean(conv, axis=(0, 2, 3), keepdims=True)
    var = jnp.mean((conv - mean) ** 2, axis=(0, 2, 3), keepdims=True)
    bn = (conv - mean) * lax.rsqrt(var + eps)
    bn = bn * gamma.reshape(1, -1, 1, 1) + beta.reshape(1, -1, 1, 1)
    gate = elu_layer * bn
    if dropout_ratio > 0.0:
        keep = dropout_uniform >= dropout_ratio
        gate = jnp.where(keep, gate / (1.0 - dropout_ratio), 0.0)
    return gate


if __name__ == "__main__":
    # Small shapes consistent with the module's constructor arguments.
    num_features = 8            # conv kernel width == input width -> W_out = 1
    in_channels = 4
    out_channels = 16
    filter_ensemble_size = 3
    dropout_ratio = 0.1
    B, H = 2, 16
    H_out = H - filter_ensemble_size + 1        # 14
    W_out = 1

    key = jax.random.PRNGKey(0)
    kx, kelu, kw_, kd = jax.random.split(key, 4)

    x = jax.random.normal(kx, (B, in_channels, H, num_features), dtype=jnp.float32)
    elu_layer = jax.nn.elu(jax.random.normal(
        kelu, (B, out_channels, H_out, W_out), dtype=jnp.float32))

    fan_in = in_channels * filter_ensemble_size * num_features
    weight = jax.random.normal(
        kw_, (out_channels, in_channels, filter_ensemble_size, num_features),
        dtype=jnp.float32) / jnp.sqrt(jnp.float32(fan_in))
    gamma = jnp.ones((out_channels,), dtype=jnp.float32)
    beta = jnp.zeros((out_channels,), dtype=jnp.float32)

    dropout_uniform = jax.random.uniform(
        kd, (B, out_channels, H_out, W_out), dtype=jnp.float32)

    out = conv_layer_forward(
        elu_layer, x, weight, gamma, beta,
        dropout_ratio=dropout_ratio, dropout_uniform=dropout_uniform)
    out = jax.block_until_ready(out)

    assert out.shape == (B, out_channels, H_out, W_out), out.shape
    assert bool(jnp.all(jnp.isfinite(out)))

    ref = _reference(elu_layer, x, weight, gamma, beta,
                     dropout_ratio=dropout_ratio,
                     dropout_uniform=dropout_uniform)
    assert bool(jnp.allclose(out, ref, rtol=5e-2, atol=5e-2)), \
        float(jnp.max(jnp.abs(out - ref)))

    # Also exercise the no-dropout fast path (uniforms stream is dropped).
    out0 = jax.block_until_ready(conv_layer_forward(
        elu_layer, x, weight, gamma, beta, dropout_ratio=0.0))
    ref0 = _reference(elu_layer, x, weight, gamma, beta,
                      dropout_ratio=0.0, dropout_uniform=None)
    assert bool(jnp.allclose(out0, ref0, rtol=5e-2, atol=5e-2))

    print("KERNEL_OK")
</pallas_src>

<mosaic_0001>
module attributes {stable_mosaic.version = 11 : i64} {
  func.func @_conv_stats_kernel(%arg0: i32, %arg1: memref<32x128xf32, #tpu.memory_space<vmem>>, %arg2: memref<128x128xf32, #tpu.memory_space<vmem>>, %arg3: memref<8x128xf32, #tpu.memory_space<vmem>>) attributes {dimension_semantics = [#tpu.dimension_semantics<arbitrary>], iteration_bounds = array<i64: 1>, scalar_prefetch = 0 : i64, scratch_operands = 0 : i64, tpu.core_type = #tpu.core_type<tc>, window_params = [{transform_indices = @transform_0, window_bounds = array<i64: 32, 128>}, {pipeline_mode = #tpu.pipeline_mode<synchronous>, transform_indices = @transform_1, window_bounds = array<i64: 128, 128>}, {pipeline_mode = #tpu.pipeline_mode<synchronous>, transform_indices = @transform_2, window_bounds = array<i64: 8, 128>}]} {
    %c0 = arith.constant 0 : index
    %c0_0 = arith.constant 0 : index
    %0 = vector.load %arg1[%c0, %c0_0] : memref<32x128xf32, #tpu.memory_space<vmem>>, vector<32x128xf32>
    %c0_1 = arith.constant 0 : index
    %c0_2 = arith.constant 0 : index
    %1 = vector.load %arg2[%c0_1, %c0_2] : memref<128x128xf32, #tpu.memory_space<vmem>>, vector<128x128xf32>
    %cst = arith.constant dense<0.000000e+00> : vector<32x128xf32>
    %2 = tpu.matmul %0, %1, %cst {dimension_numbers = #tpu.dot_dimension_numbers<[1], [0], [0], [1], [0, 0, 1, 1], [], []>} : vector<32x128xf32>, vector<128x128xf32>, vector<32x128xf32> -> vector<32x128xf32>
    %c0_i32 = arith.constant 0 : i32
    %3 = arith.cmpi eq, %arg0, %c0_i32 : i32
    %4 = arith.extui %3 : i1 to i32
    %c0_i32_3 = arith.constant 0 : i32
    %5 = arith.cmpi ne, %4, %c0_i32_3 : i32
    scf.if %5 {
      %cst_13 = arith.constant 0.000000e+00 : f32
      %28 = vector.broadcast %cst_13 : f32 to vector<8x128xf32>
      %c0_14 = arith.constant 0 : index
      %c0_15 = arith.constant 0 : index
      %29 = vector.load %arg3[%c0_14, %c0_15] : memref<8x128xf32, #tpu.memory_space<vmem>>, vector<8x128xf32>
      tpu.vector_store %arg3[%c0_14, %c0_15], %28 {strides = array<i32>} : memref<8x128xf32, #tpu.memory_space<vmem>>, vector<8x128xf32>,
    } else {
    }
    %cst_4 = arith.constant dense<0.000000e+00> : vector<128xf32>
    %6 = vector.multi_reduction <add>, %2, %cst_4 [0] : vector<32x128xf32> to vector<128xf32>
    %7 = vector.shape_cast %6 : vector<128xf32> to vector<1x128xf32>
    %8 = arith.mulf %2, %2 : vector<32x128xf32>
    %cst_5 = arith.constant dense<0.000000e+00> : vector<128xf32>
    %9 = vector.multi_reduction <add>, %8, %cst_5 [0] : vector<32x128xf32> to vector<128xf32>
    %10 = vector.shape_cast %9 : vector<128xf32> to vector<1x128xf32>
    %11 = tpu.iota {dimensions = array<i32: 0>} : vector<8x128xi32>
    %c0_i32_6 = arith.constant 0 : i32
    %12 = vector.broadcast %c0_i32_6 : i32 to vector<8x128xi32>
    %13 = arith.cmpi eq, %11, %12 : vector<8x128xi32>
    %cst_7 = arith.constant 0.000000e+00 : f32
    %14 = vector.shape_cast %7 : vector<1x128xf32> to vector<1x128xf32>
    %15 = vector.broadcast %14 : vector<1x128xf32> to vector<8x128xf32>
    %16 = vector.broadcast %cst_7 : f32 to vector<8x128xf32>
    %17 = arith.select %13, %15, %16 : vector<8x128xi1>, vector<8x128xf32>
    %c1_i32 = arith.constant 1 : i32
    %18 = vector.broadcast %c1_i32 : i32 to vector<8x128xi32>
    %19 = arith.cmpi eq, %11, %18 : vector<8x128xi32>
    %cst_8 = arith.constant 0.000000e+00 : f32
    %20 = vector.shape_cast %10 : vector<1x128xf32> to vector<1x128xf32>
    %21 = vector.broadcast %20 : vector<1x128xf32> to vector<8x128xf32>
    %22 = vector.broadcast %cst_8 : f32 to vector<8x128xf32>
    %23 = arith.select %19, %21, %22 : vector<8x128xi1>, vector<8x128xf32>
    %24 = arith.addf %17, %23 : vector<8x128xf32>
    %c0_9 = arith.constant 0 : index
    %c0_10 = arith.constant 0 : index
    %25 = vector.load %arg3[%c0_9, %c0_10] : memref<8x128xf32, #tpu.memory_space<vmem>>, vector<8x128xf32>
    %26 = arith.addf %25, %24 : vector<8x128xf32>
    %c0_11 = arith.constant 0 : index
    %c0_12 = arith.constant 0 : index
    %27 = vector.load %arg3[%c0_11, %c0_12] : memref<8x128xf32, #tpu.memory_space<vmem>>, vector<8x128xf32>
    tpu.vector_store %arg3[%c0_11, %c0_12], %26 {strides = array<i32>} : memref<8x128xf32, #tpu.memory_space<vmem>>, vector<8x128xf32>,
    return
  }
  func.func @transform_0(%arg0: i32) -> (i32, i32) {
    %c0_i32 = arith.constant 0 : i32
    %c0_i32_0 = arith.constant 0 : i32
    return %arg0, %c0_i32 : i32, i32
  }
  func.func @transform_1(%arg0: i32) -> (i32, i32) {
    %c0_i32 = arith.constant 0 : i32
    %c0_i32_0 = arith.constant 0 : i32
    %c0_i32_1 = arith.constant 0 : i32
    return %c0_i32, %c0_i32_0 : i32, i32
  }
  func.func @transform_2(%arg0: i32) -> (i32, i32) {
    %c0_i32 = arith.constant 0 : i32
    %c0_i32_0 = arith.constant 0 : i32
    %c0_i32_1 = arith.constant 0 : i32
    return %c0_i32, %c0_i32_0 : i32, i32
  }
}

</mosaic_0001>

<bundles_post_ra>
// kernel: tpu_custom_call.1
= control target key start
LH: loop header
LB: loop body
LE: loop exit
PB: predicated region body
PF: predicated region fallthrough
CT: control target
= control target key end

     0   :  { %7 = vsyncpa [#allocation3], 0  ;;  %s389_s0 = inlined_call_operand.hbm [shape: f32[32,128], index: 0, kind: input, shape index: {}]   ;;  %s390_s1 = inlined_call_operand.hbm [shape: f32[128,128], index: 1, kind: input, shape index: {}]   ;;  %s391_s2 = inlined_call_operand.hbm [shape: f32[8,128], index: 2, kind: output, shape index: {}]  }
   0x1   :  { %8 = vsyncpa [#allocation6], 0 }
   0x2   :  { %9 = vsyncpa [#allocation4], 0  ;;  %s360_s9 = smov [#allocation2]  }
   0x3   :  { %s15_s10 = sshll.u32 %s360_s9, 4  ;;  %s16_s10 = int_to_ptr.vmem [resolvable:$true] %s15_s10 }
   0x4   :  { %s302_s11 = scalar_lea.vmem %s16_s10, 512  ;;  %p307_p1 = scmp.lt.s32.totalorder %s16_s10, %s16_s10 }
   0x5   :  { %p303_p0 = scmp.ne.s32.totalorder %s16_s10, %s302_s11  ;;  %p308_p2 = scmp.lt.s32.totalorder %s302_s11, %s302_s11 }
   0x7   :  { %p309_p3 = por %p308_p2, %p307_p1 }
   0x9   :  { %p310_p4 = pnand %p309_p3, %p303_p0 }
   0xb   :  { %313 = shalt.err (!%p310_p4)
}
   0xc   :  { %s361_s12 = smov 128   ;;  %s362_s13 = smov 8  }
   0xd   :  { %21 = dma.hbm_to_vmem [thread:$0]  %s389_s0, 512, %s16_s10, [#allocation3], %s361_s12, %s361_s12, %s362_s13  }
   0xe   :  { %s363_s16 = smov [#allocation5]  }
   0xf   :  { %s27_s17 = sshll.u32 %s363_s16, 4  ;;  %s28_s17 = int_to_ptr.vmem [resolvable:$true] %s27_s17 }
  0x10   :  { %s322_s18 = scalar_lea.vmem %s28_s17, 2048  ;;  %p327_p6 = scmp.lt.s32.totalorder %s28_s17, %s28_s17 }
  0x11   :  { %p323_p5 = scmp.ne.s32.totalorder %s28_s17, %s322_s18  ;;  %p328_p7 = scmp.lt.s32.totalorder %s322_s18, %s322_s18 }
  0x13   :  { %p329_p8 = por %p328_p7, %p327_p6 }
  0x15   :  { %p330_p9 = pnand %p329_p8, %p323_p5 }
  0x17   :  { %333 = shalt.err (!%p330_p9)
}
  0x18   :  { %33 = dma.hbm_to_vmem [thread:$0]  %s390_s1, 2048, %s28_s17, [#allocation6], %s361_s12, %s361_s12, %s362_s13  }
  0x19   :  { %354 = dma.done.wait [#allocation3], 512  }
  0x1a   :  { %355 = vsyncadd [#allocation3], 4294966784 }
  0x1b   :  { %356 = dma.done.wait [#allocation6], 2048  }
  0x1c   :  { %357 = vsyncadd [#allocation6], 4294965248  ;;  %v59_v0 = vld [vmem:[#allocation5 + $0x78] sm:$0xff]  ;;  %v58_v1 = vld [vmem:[#allocation5 + $0x70] sm:$0xff]  ;;  %v172_v37 = vlaneseq  ;;  %s364_s0 = smov [#allocation7]  }
  0x1d   :  { %218 = vmatprep.subr.mxu0 %v59_v0  ;;  %256 = vmatprep.subr.mxu1 %v59_v0  ;;  %v57_v2 = vld [vmem:[#allocation5 + $0x68] sm:$0xff]  ;;  %v56_v3 = vld [vmem:[#allocation5 + $0x60] sm:$0xff]  ;;  %v55_v4 = vld [vmem:[#allocation5 + $0x58] sm:$0xff]  ;;  %s188_s1 = sshll.u32 %s364_s0, 4  ;;  %s189_s1 = int_to_ptr.vmem [resolvable:$true] %s188_s1 }
  0x1e   :  { %219 = vmatpush3.msra.mxu0 %v59_v0  ;;  %272 = vmatpush3.msra.mxu1 %v59_v0  ;;  %v54_v5 = vld [vmem:[#allocation5 + $0x50] sm:$0xff]  ;;  %v53_v6 = vld [vmem:[#allocation5 + $0x48] sm:$0xff]  ;;  %v52_v7 = vld [vmem:[#allocation5 + $0x40] sm:$0xff]  ;;  %v173_v42 = vshrl.u32 %v172_v37, 7  ;;  %s334_s21 = scalar_lea.vmem %s189_s1, 128  ;;  %p339_p11 = scmp.lt.s32.totalorder %s189_s1, %s189_s1 }
  0x1f   :  { %220 = vmatprep.subr.mxu0 %v58_v1  ;;  %257 = vmatprep.subr.mxu1 %v58_v1  ;;  %v51_v8 = vld [vmem:[#allocation5 + $0x38] sm:$0xff]  ;;  %v50_v9 = vld [vmem:[#allocation5 + $0x30] sm:$0xff]  ;;  %v49_v10 = vld [vmem:[#allocation5 + $0x28] sm:$0xff]  ;;  %p335_p10 = scmp.ne.s32.totalorder %s189_s1, %s334_s21  ;;  %p340_p12 = scmp.lt.s32.totalorder %s334_s21, %s334_s21 }
  0x20   :  { %221 = vmatpush3.msra.mxu0 %v58_v1  ;;  %273 = vmatpush3.msra.mxu1 %v58_v1  ;;  %v48_v11 = vld [vmem:[#allocation5 + $0x20] sm:$0xff]  ;;  %v47_v12 = vld [vmem:[#allocation5 + $0x18] sm:$0xff]  ;;  %v46_v13 = vld [vmem:[#allocation5 + $0x10] sm:$0xff]  ;;  %vm174_vm0 = vcmp.eq.s32.totalorder %v173_v42, 0  ;;  %vm176_vm1 = vcmp.eq.s32.totalorder %v173_v42, 1 }
  0x21   :  { %222 = vmatprep.subr.mxu0 %v57_v2  ;;  %258 = vmatprep.subr.mxu1 %v57_v2  ;;  %v45_v14 = vld [vmem:[#allocation5 + $0x8] sm:$0xff]  ;;  %v44_v15 = vld [vmem:[#allocation5] sm:$0xff]  ;;  %v42_v17 = vld [vmem:[#allocation2 + $0x10] sm:$0xff]  ;;  %p341_p13 = por %p340_p12, %p339_p11 }
  0x22   :  { %223 = vmatpush3.msra.mxu0 %v57_v2  ;;  %274 = vmatpush3.msra.mxu1 %v57_v2  ;;  %v40_v16 = vld [vmem:[#allocation2] sm:$0xff]  ;;  %v41_v18 = vld [vmem:[#allocation2 + $0x8] sm:$0xff]  ;;  %v43_v19 = vld [vmem:[#allocation2 + $0x18] sm:$0xff] }
  0x23   :  { %224 = vmatprep.subr.mxu0 %v56_v3  ;;  %259 = vmatprep.subr.mxu1 %v56_v3  ;;  %p342_p0 = pnand %p341_p13, %p335_p10 }
  0x24   :  { %225 = vmatpush3.msra.mxu0 %v56_v3  ;;  %275 = vmatpush3.msra.mxu1 %v56_v3 }
  0x25   :  { %226 = vmatprep.subr.mxu0 %v55_v4  ;;  %260 = vmatprep.subr.mxu1 %v55_v4 }
  0x26   :  { %227 = vmatpush3.msra.mxu0 %v55_v4  ;;  %276 = vmatpush3.msra.mxu1 %v55_v4 }
  0x27   :  { %228 = vmatprep.subr.mxu0 %v54_v5  ;;  %261 = vmatprep.subr.mxu1 %v54_v5 }
  0x28   :  { %229 = vmatpush3.msra.mxu0 %v54_v5  ;;  %277 = vmatpush3.msra.mxu1 %v54_v5 }
  0x29   :  { %230 = vmatprep.subr.mxu0 %v53_v6  ;;  %262 = vmatprep.subr.mxu1 %v53_v6 }
  0x2a   :  { %231 = vmatpush3.msra.mxu0 %v53_v6  ;;  %278 = vmatpush3.msra.mxu1 %v53_v6 }
  0x2b   :  { %232 = vmatprep.subr.mxu0 %v52_v7  ;;  %263 = vmatprep.subr.mxu1 %v52_v7 }
  0x2c   :  { %233 = vmatpush3.msra.mxu0 %v52_v7  ;;  %279 = vmatpush3.msra.mxu1 %v52_v7 }
  0x2d   :  { %234 = vmatprep.subr.mxu0 %v51_v8  ;;  %264 = vmatprep.subr.mxu1 %v51_v8 }
  0x2e   :  { %235 = vmatpush3.msra.mxu0 %v51_v8  ;;  %280 = vmatpush3.msra.mxu1 %v51_v8 }
  0x2f   :  { %236 = vmatprep.subr.mxu0 %v50_v9  ;;  %265 = vmatprep.subr.mxu1 %v50_v9 }
  0x30   :  { %237 = vmatpush3.msra.mxu0 %v50_v9  ;;  %281 = vmatpush3.msra.mxu1 %v50_v9 }
  0x31   :  { %238 = vmatprep.subr.mxu0 %v49_v10  ;;  %266 = vmatprep.subr.mxu1 %v49_v10 }
  0x32   :  { %239 = vmatpush3.msra.mxu0 %v49_v10  ;;  %282 = vmatpush3.msra.mxu1 %v49_v10 }
  0x33   :  { %240 = vmatprep.subr.mxu0 %v48_v11  ;;  %267 = vmatprep.subr.mxu1 %v48_v11 }
  0x34   :  { %241 = vmatpush3.msra.mxu0 %v48_v11  ;;  %283 = vmatpush3.msra.mxu1 %v48_v11 }
  0x35   :  { %242 = vmatprep.subr.mxu0 %v47_v12  ;;  %268 = vmatprep.subr.mxu1 %v47_v12 }
  0x36   :  { %243 = vmatpush3.msra.mxu0 %v47_v12  ;;  %284 = vmatpush3.msra.mxu1 %v47_v12 }
  0x37   :  { %244 = vmatprep.subr.mxu0 %v46_v13  ;;  %269 = vmatprep.subr.mxu1 %v46_v13 }
  0x38   :  { %245 = vmatpush3.msra.mxu0 %v46_v13  ;;  %285 = vmatpush3.msra.mxu1 %v46_v13 }
  0x39   :  { %246 = vmatprep.subr.mxu0 %v45_v14  ;;  %270 = vmatprep.subr.mxu1 %v45_v14 }
  0x3a   :  { %247 = vmatpush3.msra.mxu0 %v45_v14  ;;  %286 = vmatpush3.msra.mxu1 %v45_v14 }
  0x3b   :  { %248 = vmatprep.subr.mxu0 %v44_v15  ;;  %271 = vmatprep.subr.mxu1 %v44_v15 }
  0x3c   :  { %249 = vmatpush3.msra.mxu0 %v44_v15  ;;  %287 = vmatpush3.msra.mxu1 %v44_v15 }
  0x3d   :  { %250 = vmatprep.mubr.f32.mxu0 %v40_v16  ;;  %253 = vmatprep.mubr.f32.mxu1 %v42_v17 }
  0x3e   :  { %251 = vmatmul.mubr.f32.vlgmr.msra.gmra.mxu0 %v41_v18  ;;  %254 = vmatmul.mubr.f32.vlgmr.msra.gmra.mxu1 %v43_v19 }
  0xfe   :  { %v252_v20 = vpop.f32.mrf.mxu0  ;;  %v255_v21 = vpop.f32.mrf.mxu1 }
  0xff   :  { %v160_v24 = vmul.f32 %v252_v20, %v252_v20  ;;  %v162_v30 = vmul.f32 %v255_v21, %v255_v21 }
 0x100   :  { %v126_v22 = vpop.f32.mrf.mxu0  ;;  %v136_v23 = vpop.f32.mrf.mxu1 }
 0x101   :  { %v150_v25 = vadd.f32 %v252_v20, %v126_v22  ;;  %v159_v26 = vmul.f32 %v126_v22, %v126_v22  ;;  %v161_v29 = vmul.f32 %v136_v23, %v136_v23 }
 0x103   :  { %v163_v27 = vadd.f32 %v160_v24, %v159_v26  ;;  %v151_v28 = vadd.f32 %v150_v25, %v136_v23 }
 0x105   :  { %v152_v31 = vadd.f32 %v255_v21, %v151_v28  ;;  %v164_v32 = vadd.f32 %v163_v27, %v161_v29 }
 0x107   :  { %v153_v33 = vrot.slane %v152_v31, 4  ;;  %v165_v34 = vadd.f32 %v164_v32, %v162_v30 }
 0x109   :  { %v154_v35 = vadd.f32 %v153_v33, %v152_v31  ;;  %v166_v36 = vrot.slane %v165_v34, 4 }
 0x10b   :  { %v155_v38 = vrot.slane %v154_v35, 2  ;;  %v167_v39 = vadd.f32 %v166_v36, %v165_v34 }
 0x10d   :  { %v156_v40 = vadd.f32 %v155_v38, %v154_v35  ;;  %v168_v41 = vrot.slane %v167_v39, 2 }
 0x10f   :  { %v157_v43 = vrot.slane %v156_v40, 1  ;;  %v169_v44 = vadd.f32 %v168_v41, %v167_v39 }
 0x111   :  { %v158_v45 = vadd.f32 %v157_v43, %v156_v40  ;;  %v170_v46 = vrot.slane %v169_v44, 1 }
 0x113   :  { %v171_v47 = vadd.f32 %v170_v46, %v169_v44  ;;  %v175_v48 = vsel %vm174_vm0, %v158_v45, 0.0 }
 0x115   :  { %v177_v49 = vsel %vm176_vm1, %v171_v47, 0.0 }
 0x116   :  { %v178_v50 = vadd.f32 %v177_v49, %v175_v48 }
 0x118   :  { %181 = vst [vmem:[#allocation7] sm:$0xff] %v178_v50 }
 0x119   :  { %345 = shalt.err (!%p342_p0)
}
 0x11a   :  { %191 = dma.vmem_to_hbm [thread:$0]  %s189_s1, 128, %s391_s2, [#allocation4]  }
 0x11b   :  { %358 = dma.done.wait [#allocation4], 128  }
 0x11c   :  { %359 = vsyncadd [#allocation4], 4294967168 }
 0x11d   :  { %195 = vsyncpa [#allocation3], 1 }
 0x11e   :  { %196 = vsyncpa [#allocation6], 1 }
 0x11f   :  { %197 = vsyncpa [#allocation4], 1 }

</bundles_post_ra>
